<compile_context>
chip_gen: v6e
topology: v6e:2x2x1
jax: 0.10.0
libtpu: 0.0.40
codegen_flags: <defaults>
</compile_context>

<pallas_src>
import jax
import jax.numpy as jnp
from jax.experimental import pallas as pl
from jax.experimental.pallas import tpu as pltpu


def _round_up(n, m):
    return ((n + m - 1) // m) * m


# -----------------------------------------------------------------------------
# Single fused kernel:
#   mean-aggregate neighbours -> SAGEConv (lin_l(agg) + lin_r(x) + b_l)
#   -> fc -> sigmoid
# -----------------------------------------------------------------------------
def gnn_fused_kernel(src_ref, tgt_ref, x_ref, wl_ref, bl_ref, wr_ref,
                     wfc_ref, bfc_ref, h_ref, p_ref):
    n_pad, _ = x_ref.shape
    e_pad = tgt_ref.shape[1]

    # One-hot edge masks (padded edges carry id -1 and match nothing).
    # m_tgt[i, e] = 1 if edge e targets node i           -> shape (N_pad, E_pad)
    node_ids_ne = jax.lax.broadcasted_iota(jnp.int32, (n_pad, e_pad), 0)
    m_tgt = (node_ids_ne == tgt_ref[...]).astype(jnp.float32)
    # m_src_t[e, j] = 1 if edge e has source node j      -> shape (E_pad, N_pad)
    node_ids_en = jax.lax.broadcasted_iota(jnp.int32, (e_pad, n_pad), 1)
    m_src_t = (node_ids_en == src_ref[...]).astype(jnp.float32)

    # counts[i, j] = number of edges j -> i   (single MXU matmul, no edge loop)
    counts = jnp.dot(m_tgt, m_src_t, preferred_element_type=jnp.float32)
    deg = jnp.sum(m_tgt, axis=1, keepdims=True)                     # in-degree
    inv_deg = jnp.where(deg > 0.0, 1.0 / jnp.maximum(deg, 1.0), 0.0)
    a_mean = (counts * inv_deg).astype(jnp.bfloat16)                # row-normalized

    x = x_ref[...]
    x_bf = x.astype(jnp.bfloat16)
    # mean of neighbour features
    x_agg = jnp.dot(a_mean, x_bf, preferred_element_type=jnp.float32)

    # SAGEConv: lin_l(mean_agg) + lin_r(x); bias only on lin_l (PyG default).
    h = (jnp.dot(x_agg.astype(jnp.bfloat16), wl_ref[...],
                 preferred_element_type=jnp.float32)
         + jnp.dot(x_bf, wr_ref[...], preferred_element_type=jnp.float32)
         + bl_ref[...])
    h_ref[...] = h

    # fc + sigmoid (sigmoid -> EUP slot, essentially free next to the matmuls).
    logits = jnp.dot(h.astype(jnp.bfloat16), wfc_ref[...],
                     preferred_element_type=jnp.float32) + bfc_ref[...]
    p_ref[...] = jax.nn.sigmoid(logits)


# -----------------------------------------------------------------------------
# Parameter construction (PyTorch layout) + one-time TPU-friendly prep.
# -----------------------------------------------------------------------------
def init_params(key, hidden_lstm, hidden_gnn, out_channels):
    ks = jax.random.split(key, 5)
    k_conv = 1.0 / jnp.sqrt(jnp.float32(hidden_lstm))
    k_fc = 1.0 / jnp.sqrt(jnp.float32(hidden_gnn))
    return dict(
        w_l=jax.random.uniform(ks[0], (hidden_gnn, hidden_lstm), jnp.float32,
                               -k_conv, k_conv),
        b_l=jax.random.uniform(ks[1], (hidden_gnn,), jnp.float32, -k_conv, k_conv),
        w_r=jax.random.uniform(ks[2], (hidden_gnn, hidden_lstm), jnp.float32,
                               -k_conv, k_conv),
        w_fc=jax.random.uniform(ks[3], (out_channels, hidden_gnn), jnp.float32,
                                -k_fc, k_fc),
        b_fc=jax.random.uniform(ks[4], (out_channels,), jnp.float32, -k_fc, k_fc),
    )


def prepare_params(params, hidden_lstm, hidden_gnn, out_channels):
    """One-time: transpose to (in, out), zero-pad feature dims to 128 lanes,
    pre-cast matmul weights to bf16 (biases stay f32)."""
    f_pad = _round_up(hidden_lstm, 128)
    h_pad = _round_up(hidden_gnn, 128)
    o_pad = _round_up(out_channels, 128)

    def pad2(a, rows, cols):
        out = jnp.zeros((rows, cols), a.dtype)
        return out.at[:a.shape[0], :a.shape[1]].set(a)

    return dict(
        wl=pad2(params["w_l"].T, f_pad, h_pad).astype(jnp.bfloat16),
        wr=pad2(params["w_r"].T, f_pad, h_pad).astype(jnp.bfloat16),
        wfc=pad2(params["w_fc"].T, h_pad, o_pad).astype(jnp.bfloat16),
        bl=pad2(params["b_l"][None, :], 1, h_pad),
        bfc=pad2(params["b_fc"][None, :], 1, o_pad),
        dims=(hidden_lstm, hidden_gnn, out_channels, f_pad, h_pad, o_pad),
    )


# -----------------------------------------------------------------------------
# Forward: matches GNN.forward with backbone='GraphSAGE':
#   h = SAGEConv(x, edge_index);  return (h, fc(h).sigmoid().squeeze())
# -----------------------------------------------------------------------------
def gnn_forward(prep, x, edge_index):
    hidden_lstm, hidden_gnn, out_channels, f_pad, h_pad, o_pad = prep["dims"]
    n, f = x.shape
    assert f == hidden_lstm
    n_pad = _round_up(n, 8)
    e = edge_index.shape[1]
    e_pad = _round_up(e, 128)

    x_p = jnp.zeros((n_pad, f_pad), jnp.float32).at[:n, :f].set(x)
    # Pad edges with id -1 so they match no node in the one-hot masks.
    src_p = jnp.full((e_pad, 1), -1, jnp.int32).at[:e, 0].set(
        edge_index[0].astype(jnp.int32))
    tgt_p = jnp.full((1, e_pad), -1, jnp.int32).at[0, :e].set(
        edge_index[1].astype(jnp.int32))

    h_p, p_p = pl.pallas_call(
        gnn_fused_kernel,
        out_shape=(jax.ShapeDtypeStruct((n_pad, h_pad), jnp.float32),
                   jax.ShapeDtypeStruct((n_pad, o_pad), jnp.float32)),
        in_specs=[pl.BlockSpec(memory_space=pltpu.MemorySpace.VMEM)] * 8,
        out_specs=(pl.BlockSpec(memory_space=pltpu.MemorySpace.VMEM),
                   pl.BlockSpec(memory_space=pltpu.MemorySpace.VMEM)),
    )(src_p, tgt_p, x_p, prep["wl"], prep["bl"], prep["wr"],
      prep["wfc"], prep["bfc"])

    h = h_p[:n, :hidden_gnn]
    probs = jnp.squeeze(p_p[:n, :out_channels])   # fc(x).sigmoid().squeeze()
    return h, probs


if __name__ == "__main__":
    N_NODES = 16
    N_EDGES = 48
    HIDDEN_LSTM = 32     # input feature dim (LSTM embedding size in ECSeq)
    HIDDEN_GNN = 32
    OUT_CHANNELS = 1

    key = jax.random.PRNGKey(0)
    key, kx, ke, kp = jax.random.split(key, 4)
    x = jax.random.normal(kx, (N_NODES, HIDDEN_LSTM), jnp.float32)
    edge_index = jax.random.randint(ke, (2, N_EDGES), 0, N_NODES, dtype=jnp.int32)

    params = init_params(kp, HIDDEN_LSTM, HIDDEN_GNN, OUT_CHANNELS)
    prep = prepare_params(params, HIDDEN_LSTM, HIDDEN_GNN, OUT_CHANNELS)

    h, probs = gnn_forward(prep, x, edge_index)
    jax.block_until_ready((h, probs))

    assert h.shape == (N_NODES, HIDDEN_GNN)
    assert probs.shape == (N_NODES,)
    assert bool(jnp.all(jnp.isfinite(h)))
    assert bool(jnp.all((probs >= 0.0) & (probs <= 1.0)))
    print("KERNEL_OK")
</pallas_src>

<mosaic_0001>
module attributes {stable_mosaic.version = 11 : i64} {
  func.func @gnn_fused_kernel(%arg0: memref<128x1xi32, #tpu.memory_space<vmem>>, %arg1: memref<1x128xi32, #tpu.memory_space<vmem>>, %arg2: memref<16x128xf32, #tpu.memory_space<vmem>>, %arg3: memref<128x128xbf16, #tpu.memory_space<vmem>>, %arg4: memref<1x128xf32, #tpu.memory_space<vmem>>, %arg5: memref<128x128xbf16, #tpu.memory_space<vmem>>, %arg6: memref<128x128xbf16, #tpu.memory_space<vmem>>, %arg7: memref<1x128xf32, #tpu.memory_space<vmem>>, %arg8: memref<16x128xf32, #tpu.memory_space<vmem>>, %arg9: memref<16x128xf32, #tpu.memory_space<vmem>>) attributes {dimension_semantics = [], scalar_prefetch = 0 : i64, scratch_operands = 0 : i64, tpu.core_type = #tpu.core_type<tc>} {
    %0 = tpu.iota {dimensions = array<i32: 0>} : vector<16x128xi32>
    %c0 = arith.constant 0 : index
    %c0_0 = arith.constant 0 : index
    %1 = vector.load %arg1[%c0, %c0_0] : memref<1x128xi32, #tpu.memory_space<vmem>>, vector<1x128xi32>
    %2 = vector.broadcast %1 : vector<1x128xi32> to vector<16x128xi32>
    %3 = arith.cmpi eq, %0, %2 : vector<16x128xi32>
    %4 = arith.extui %3 : vector<16x128xi1> to vector<16x128xi32>
    %5 = arith.sitofp %4 : vector<16x128xi32> to vector<16x128xf32>
    %6 = tpu.iota {dimensions = array<i32: 1>} : vector<128x16xi32>
    %c0_1 = arith.constant 0 : index
    %c0_2 = arith.constant 0 : index
    %7 = vector.load %arg0[%c0_1, %c0_2] : memref<128x1xi32, #tpu.memory_space<vmem>>, vector<128x1xi32>
    %8 = vector.broadcast %7 : vector<128x1xi32> to vector<128x16xi32>
    %9 = arith.cmpi eq, %6, %8 : vector<128x16xi32>
    %10 = arith.extui %9 : vector<128x16xi1> to vector<128x16xi32>
    %11 = arith.sitofp %10 : vector<128x16xi32> to vector<128x16xf32>
    %cst = arith.constant dense<0.000000e+00> : vector<16x16xf32>
    %12 = tpu.matmul %5, %11, %cst {dimension_numbers = #tpu.dot_dimension_numbers<[1], [0], [0], [1], [0, 0, 1, 1], [], []>} : vector<16x128xf32>, vector<128x16xf32>, vector<16x16xf32> -> vector<16x16xf32>
    %cst_3 = arith.constant dense<0.000000e+00> : vector<16xf32>
    %13 = vector.multi_reduction <add>, %5, %cst_3 [1] : vector<16x128xf32> to vector<16xf32>
    %14 = vector.shape_cast %13 : vector<16xf32> to vector<16x1xf32>
    %cst_4 = arith.constant 0.000000e+00 : f32
    %15 = vector.broadcast %cst_4 : f32 to vector<16x1xf32>
    %16 = arith.cmpf ogt, %14, %15 : vector<16x1xf32>
    %cst_5 = arith.constant 1.000000e+00 : f32
    %17 = vector.broadcast %cst_5 : f32 to vector<16x1xf32>
    %18 = arith.maximumf %14, %17 : vector<16x1xf32>
    %cst_6 = arith.constant 1.000000e+00 : f32
    %19 = vector.broadcast %cst_6 : f32 to vector<16x1xf32>
    %20 = arith.divf %19, %18 : vector<16x1xf32>
    %cst_7 = arith.constant 0.000000e+00 : f32
    %21 = vector.broadcast %cst_7 : f32 to vector<16x1xf32>
    %22 = arith.select %16, %20, %21 : vector<16x1xi1>, vector<16x1xf32>
    %23 = vector.broadcast %22 : vector<16x1xf32> to vector<16x16xf32>
    %24 = arith.mulf %12, %23 : vector<16x16xf32>
    %25 = arith.truncf %24 : vector<16x16xf32> to vector<16x16xbf16>
    %c0_8 = arith.constant 0 : index
    %c0_9 = arith.constant 0 : index
    %26 = vector.load %arg2[%c0_8, %c0_9] : memref<16x128xf32, #tpu.memory_space<vmem>>, vector<16x128xf32>
    %27 = arith.truncf %26 : vector<16x128xf32> to vector<16x128xbf16>
    %cst_10 = arith.constant dense<0.000000e+00> : vector<16x128xf32>
    %28 = tpu.matmul %25, %27, %cst_10 {dimension_numbers = #tpu.dot_dimension_numbers<[1], [0], [0], [1], [0, 0, 1, 1], [], []>} : vector<16x16xbf16>, vector<16x128xbf16>, vector<16x128xf32> -> vector<16x128xf32>
    %29 = arith.truncf %28 : vector<16x128xf32> to vector<16x128xbf16>
    %c0_11 = arith.constant 0 : index
    %c0_12 = arith.constant 0 : index
    %30 = vector.load %arg3[%c0_11, %c0_12] : memref<128x128xbf16, #tpu.memory_space<vmem>>, vector<128x128xbf16>
    %cst_13 = arith.constant dense<0.000000e+00> : vector<16x128xf32>
    %31 = tpu.matmul %29, %30, %cst_13 {dimension_numbers = #tpu.dot_dimension_numbers<[1], [0], [0], [1], [0, 0, 1, 1], [], []>} : vector<16x128xbf16>, vector<128x128xbf16>, vector<16x128xf32> -> vector<16x128xf32>
    %c0_14 = arith.constant 0 : index
    %c0_15 = arith.constant 0 : index
    %32 = vector.load %arg5[%c0_14, %c0_15] : memref<128x128xbf16, #tpu.memory_space<vmem>>, vector<128x128xbf16>
    %cst_16 = arith.constant dense<0.000000e+00> : vector<16x128xf32>
    %33 = tpu.matmul %27, %32, %cst_16 {dimension_numbers = #tpu.dot_dimension_numbers<[1], [0], [0], [1], [0, 0, 1, 1], [], []>} : vector<16x128xbf16>, vector<128x128xbf16>, vector<16x128xf32> -> vector<16x128xf32>
    %34 = arith.addf %31, %33 : vector<16x128xf32>
    %c0_17 = arith.constant 0 : index
    %c0_18 = arith.constant 0 : index
    %35 = vector.load %arg4[%c0_17, %c0_18] : memref<1x128xf32, #tpu.memory_space<vmem>>, vector<1x128xf32>
    %36 = vector.broadcast %35 : vector<1x128xf32> to vector<16x128xf32>
    %37 = arith.addf %34, %36 : vector<16x128xf32>
    %c0_19 = arith.constant 0 : index
    %c0_20 = arith.constant 0 : index
    %38 = vector.load %arg8[%c0_19, %c0_20] : memref<16x128xf32, #tpu.memory_space<vmem>>, vector<16x128xf32>
    tpu.vector_store %arg8[%c0_19, %c0_20], %37 {strides = array<i32>} : memref<16x128xf32, #tpu.memory_space<vmem>>, vector<16x128xf32>,
    %39 = arith.truncf %37 : vector<16x128xf32> to vector<16x128xbf16>
    %c0_21 = arith.constant 0 : index
    %c0_22 = arith.constant 0 : index
    %40 = vector.load %arg6[%c0_21, %c0_22] : memref<128x128xbf16, #tpu.memory_space<vmem>>, vector<128x128xbf16>
    %cst_23 = arith.constant dense<0.000000e+00> : vector<16x128xf32>
    %41 = tpu.matmul %39, %40, %cst_23 {dimension_numbers = #tpu.dot_dimension_numbers<[1], [0], [0], [1], [0, 0, 1, 1], [], []>} : vector<16x128xbf16>, vector<128x128xbf16>, vector<16x128xf32> -> vector<16x128xf32>
    %c0_24 = arith.constant 0 : index
    %c0_25 = arith.constant 0 : index
    %42 = vector.load %arg7[%c0_24, %c0_25] : memref<1x128xf32, #tpu.memory_space<vmem>>, vector<1x128xf32>
    %43 = vector.broadcast %42 : vector<1x128xf32> to vector<16x128xf32>
    %44 = arith.addf %41, %43 : vector<16x128xf32>
    %45 = arith.negf %44 : vector<16x128xf32>
    %46 = math.exp %45 : vector<16x128xf32>
    %cst_26 = arith.constant 1.000000e+00 : f32
    %47 = vector.broadcast %cst_26 : f32 to vector<16x128xf32>
    %48 = arith.addf %47, %46 : vector<16x128xf32>
    %49 = arith.divf %47, %48 : vector<16x128xf32>
    %c0_27 = arith.constant 0 : index
    %c0_28 = arith.constant 0 : index
    %50 = vector.load %arg9[%c0_27, %c0_28] : memref<16x128xf32, #tpu.memory_space<vmem>>, vector<16x128xf32>
    tpu.vector_store %arg9[%c0_27, %c0_28], %49 {strides = array<i32>} : memref<16x128xf32, #tpu.memory_space<vmem>>, vector<16x128xf32>,
    return
  }
}

</mosaic_0001>

<bundles_post_ra>
// kernel: tpu_custom_call.1
= control target key start
LH: loop header
LB: loop body
LE: loop exit
PB: predicated region body
PF: predicated region fallthrough
CT: control target
= control target key end

     0   :  { %15 = vsyncpa [#allocation3], 0  ;;  %s1357_s0 = inlined_call_operand.vmem [shape: s32[128,1], index: 0, kind: input, shape index: {}]   ;;  %s1358_s1 = inlined_call_operand.vmem [shape: s32[1,128], index: 1, kind: input, shape index: {}]   ;;  %s1359_s2 = inlined_call_operand.hbm [shape: f32[16,128], index: 2, kind: input, shape index: {}]   ;;  %s1360_s3 = inlined_call_operand.vmem [shape: bf16[128,128], index: 3, kind: input, shape index: {}]   ;;  %s1361_s4 = inlined_call_operand.vmem [shape: f32[1,128], index: 4, kind: input, shape index: {}]   ;;  %s1362_s5 = inlined_call_operand.vmem [shape: bf16[128,128], index: 5, kind: input, shape index: {}]   ;;  %s1363_s6 = inlined_call_operand.hbm [shape: bf16[128,128], index: 6, kind: input, shape index: {}]   ;;  %s1364_s7 = inlined_call_operand.vmem [shape: f32[1,128], index: 7, kind: input, shape index: {}]   ;;  %s1365_s8 = inlined_call_operand.hbm [shape: f32[16,128], index: 8, kind: output, shape index: {0}]   ;;  %s1366_s9 = inlined_call_operand.hbm [shape: f32[16,128], index: 9, kind: output, shape index: {1}]  }
   0x1   :  { %16 = vsyncpa [#allocation6], 0 }
   0x2   :  { %17 = vsyncpa [#allocation4], 0 }
   0x3   :  { %18 = vsyncpa [#allocation9], 0  ;;  %s1065_s30 = smov [#allocation2]  }
   0x4   :  { %s28_s10 = sshll.u32 %s1065_s30, 4  ;;  %s29_s10 = int_to_ptr.vmem [resolvable:$true] %s28_s10 }
   0x5   :  { %s985_s11 = scalar_lea.vmem %s29_s10, 256  ;;  %p990_p1 = scmp.lt.s32.totalorder %s29_s10, %s29_s10 }
   0x6   :  { %p986_p0 = scmp.ne.s32.totalorder %s29_s10, %s985_s11  ;;  %p991_p2 = scmp.lt.s32.totalorder %s985_s11, %s985_s11 }
   0x8   :  { %p992_p3 = por %p991_p2, %p990_p1 }
   0xa   :  { %p993_p4 = pnand %p992_p3, %p986_p0 }
   0xc   :  { %996 = shalt.err (!%p993_p4)
}
   0xd   :  { %s1066_s12 = smov 128   ;;  %s1067_s13 = smov 8  }
   0xe   :  { %34 = dma.hbm_to_vmem [thread:$0]  %s1359_s2, 256, %s29_s10, [#allocation3], %s1066_s12, %s1066_s12, %s1067_s13  }
   0xf   :  { %s1068_s16 = smov [#allocation5]  }
  0x10   :  { %s46_s17 = sshll.u32 %s1068_s16, 4  ;;  %s47_s17 = int_to_ptr.vmem [resolvable:$true] %s46_s17 }
  0x11   :  { %s1005_s18 = scalar_lea.vmem %s47_s17, 1024  ;;  %p1010_p6 = scmp.lt.s32.totalorder %s47_s17, %s47_s17 }
  0x12   :  { %p1006_p5 = scmp.ne.s32.totalorder %s47_s17, %s1005_s18  ;;  %p1011_p7 = scmp.lt.s32.totalorder %s1005_s18, %s1005_s18 }
  0x14   :  { %p1012_p8 = por %p1011_p7, %p1010_p6 }
  0x16   :  { %p1013_p9 = pnand %p1012_p8, %p1006_p5 }
  0x18   :  { %1016 = shalt.err (!%p1013_p9)
}
  0x19   :  { %s1069_s19 = smov 64   ;;  %s1070_s20 = smov 4  }
  0x1a   :  { %52 = dma.hbm_to_vmem [thread:$0]  %s1363_s6, 1024, %s47_s17, [#allocation6], %s1069_s19, %s1069_s19, %s1070_s20  }
  0x1b   :  { %1057 = dma.done.wait [#allocation3], 256  }
  0x1c   :  { %1058 = vsyncadd [#allocation3], 4294967040 }
  0x1d   :  { %1059 = dma.done.wait [#allocation6], 1024  }
  0x1e   :  { %1060 = vsyncadd [#allocation6], 4294966272  ;;  %v1071_v0 = vmov 0   ;;  %v93_v1 = vld [vmem:[%s1357_s0 + $0x78] sm:$0xff]  ;;  %v91_v2 = vld [vmem:[%s1357_s0 + $0x68] sm:$0xff]  ;;  %v62_v15 = vlaneseq  ;;  %v1072_v20 = vmov 1.0  }
  0x1f   :  { %940 = vset.pattern.permute.xlu1 %v1071_v0  ;;  %939 = vset.pattern.permute.xlu0 %v1071_v0  ;;  %v92_v3 = vld [vmem:[%s1357_s0 + $0x70] sm:$0xff]  ;;  %v90_v4 = vld [vmem:[%s1357_s0 + $0x60] sm:$0xff]  ;;  %v89_v5 = vld [vmem:[%s1357_s0 + $0x58] sm:$0xff]  ;;  %v1073_v21 = vmov 0.0   ;;  %s1075_s22 = smov [#allocation7]  }
  0x20   :  { %140 = vperm.xlu0 %939, %v93_v1   ;;  %134 = vperm.xlu1 %940, %v91_v2   ;;  %v88_v6 = vld [vmem:[%s1357_s0 + $0x50] sm:$0xff]  ;;  %v87_v7 = vld [vmem:[%s1357_s0 + $0x48] sm:$0xff]  ;;  %v86_v8 = vld [vmem:[%s1357_s0 + $0x40] sm:$0xff]  ;;  %v63_v18 = vshrl.u32 %v62_v15, 7  ;;  %v1201_v25 = vand.u32 127, %v62_v15  ;;  %s684_s2 = sshll.u32 %s1075_s22, 4  ;;  %s685_s2 = int_to_ptr.vmem [resolvable:$true] %s684_s2 }
  0x21   :  { %v85_v9 = vld [vmem:[%s1357_s0 + $0x38] sm:$0xff]  ;;  %v84_v10 = vld [vmem:[%s1357_s0 + $0x30] sm:$0xff]  ;;  %v83_v11 = vld [vmem:[%s1357_s0 + $0x28] sm:$0xff]  ;;  %861 = vmatprep.subr.bf16.mxu1 %v1073_v21  ;;  %s1017_s23 = scalar_lea.vmem %s685_s2, 256  ;;  %p1022_p11 = scmp.lt.s32.totalorder %s685_s2, %s685_s2 }
  0x22   :  { %v82_v12 = vld [vmem:[%s1357_s0 + $0x20] sm:$0xff]  ;;  %v81_v13 = vld [vmem:[%s1357_s0 + $0x18] sm:$0xff]  ;;  %v80_v14 = vld [vmem:[%s1357_s0 + $0x10] sm:$0xff]  ;;  %v1192_v22 = vadd.s32 8, %v63_v18  ;;  %p1018_p10 = scmp.ne.s32.totalorder %s685_s2, %s1017_s23  ;;  %p1023_p12 = scmp.lt.s32.totalorder %s1017_s23, %s1017_s23 }
  0x23   :  { %v79_v16 = vld [vmem:[%s1357_s0 + $0x8] sm:$0xff]  ;;  %v78_v17 = vld [vmem:[%s1357_s0] sm:$0xff]  ;;  %v943_v45 = vld [vmem:[%s1360_s3 + $0x38] sm:$0xff]  }
  0x24   :  { %137 = vperm.xlu0 %939, %v92_v3   ;;  %131 = vperm.xlu1 %940, %v90_v4   ;;  %v1187_v19 = vld [vmem:[%s1358_s1] ss:$0 sm:$0xff]  ;;  %v283_v43 = vld [vmem:[#allocation2 + $0x8] sm:$0xff]  ;;  %v945_v46 = vld [vmem:[%s1360_s3 + $0x30] sm:$0xff]   ;;  %p1024_p13 = por %p1023_p12, %p1022_p11 }
  0x25   :  { %vm70_vm0 = vcmp.eq.s32.totalorder %v63_v18, %v1187_v19  ;;  %vm71_vm1 = vcmp.eq.s32.totalorder %v1192_v22, %v1187_v19  ;;  %v282_v42 = vld [vmem:[#allocation2] sm:$0xff]  ;;  %v947_v47 = vld [vmem:[%s1360_s3 + $0x28] sm:$0xff]   ;;  %v951_v49 = vld [vmem:[%s1360_s3 + $0x18] sm:$0xff]  }
  0x26   :  { %858 = vmatprep.mubr.msk.f32.mxu0 %vm70_vm0, %v1072_v20  ;;  %v714_v23 = vsel %vm70_vm0, 1.0, %v1073_v21  ;;  %v715_v24 = vsel %vm71_vm1, 1.0, %v1073_v21  ;;  %v1256_v44 = vpack.c.bf16 %v283_v43, %v282_v42  ;;  %v949_v48 = vld [vmem:[%s1360_s3 + $0x20] sm:$0xff]   ;;  %v953_v50 = vld [vmem:[%s1360_s3 + $0x10] sm:$0xff]   ;;  %v941_v63 = vld [vmem:[%s1362_s5 + $0x38] sm:$0xff]   ;;  %p1025_p0 = pnand %p1024_p13, %p1018_p10 }
  0x27   :  { %v942_v1 = vld [vmem:[%s1362_s5 + $0x30] sm:$0xff]   ;;  %v944_v2 = vld [vmem:[%s1362_s5 + $0x28] sm:$0xff]   ;;  %v946_v3 = vld [vmem:[%s1362_s5 + $0x20] sm:$0xff]  }
  0x28   :  { %128 = vperm.xlu0 %939, %v89_v5   ;;  %125 = vperm.xlu1 %940, %v88_v6   ;;  %v948_v4 = vld [vmem:[%s1362_s5 + $0x18] sm:$0xff]   ;;  %v950_v5 = vld [vmem:[%s1362_s5 + $0x10] sm:$0xff]   ;;  %v952_v6 = vld [vmem:[%s1362_s5 + $0x8] sm:$0xff]  }
  0x29   :  { %862 = vmatpush3.bf16.msra.mxu1 %v1256_v44 }
  0x2a   :  { %867 = vmatprep.subr.bf16.mxu1 %v1073_v21 }
  0x2c   :  { %122 = vperm.xlu0 %939, %v87_v7   ;;  %119 = vperm.xlu1 %940, %v86_v8   ;;  %v954_v7 = vld [vmem:[%s1362_s5] sm:$0xff]   ;;  %v955_v8 = vld [vmem:[%s1360_s3 + $0x8] sm:$0xff]  }
  0x30   :  { %116 = vperm.xlu0 %939, %v85_v9   ;;  %113 = vperm.xlu1 %940, %v84_v10   ;;  %v956_v9 = vld [vmem:[%s1360_s3] sm:$0xff]   ;;  %v957_v10 = vld [vmem:[#allocation5 + $0x38] sm:$0xff]  }
  0x34   :  { %110 = vperm.xlu0 %939, %v83_v11   ;;  %107 = vperm.xlu1 %940, %v82_v12   ;;  %v958_v11 = vld [vmem:[#allocation5 + $0x30] sm:$0xff]   ;;  %v959_v12 = vld [vmem:[#allocation5 + $0x28] sm:$0xff]  }
  0x38   :  { %104 = vperm.xlu0 %939, %v81_v13   ;;  %101 = vperm.xlu1 %940, %v80_v14   ;;  %v960_v13 = vld [vmem:[#allocation5 + $0x20] sm:$0xff]   ;;  %v961_v14 = vld [vmem:[#allocation5 + $0x18] sm:$0xff]  }
  0x3c   :  { %98 = vperm.xlu0 %939, %v79_v16   ;;  %95 = vperm.xlu1 %940, %v78_v17  }
  0x5b   :  { %265 = vadd.xlane.f32.xlu0 %v714_v23 }
  0x60   :  { %267 = vadd.xlane.f32.xlu1 %v715_v24 }
  0x9b   :  { %v141_v26 = vpop.permute.xlu0 %140  ;;  %v135_v27 = vpop.permute.xlu1 %134 }
  0x9c   :  { %vm157_vm2 = vcmp.eq.s32.totalorder %v1201_v25, %v141_v26  ;;  %vm155_vm4 = vcmp.eq.s32.totalorder %v1201_v25, %v135_v27  ;;  %v963_v26 = vld [vmem:[#allocation5 + $0x8] sm:$0xff]   ;;  %v964_v27 = vld [vmem:[#allocation5] sm:$0xff]  }
  0x9d   :  { %826 = vmatprep.subr.msk.mxu0 %vm157_vm2, %v1072_v20 }
  0x9e   :  { %827 = vmatpush3.msk.msra.mxu0 %vm157_vm2, %v1072_v20 }
  0x9f   :  { %v138_v28 = vpop.permute.xlu0 %137  ;;  %v132_v29 = vpop.permute.xlu1 %131 }
  0xa0   :  { %vm156_vm3 = vcmp.eq.s32.totalorder %v1201_v25, %v138_v28  ;;  %vm154_vm5 = vcmp.eq.s32.totalorder %v1201_v25, %v132_v29  ;;  %v767_v29 = vld [vmem:[%s1361_s4] ss:$0 sm:$0xff] }
  0xa1   :  { %828 = vmatprep.subr.msk.mxu0 %vm156_vm3, %v1072_v20 }
  0xa2   :  { %829 = vmatpush3.msk.msra.mxu0 %vm156_vm3, %v1072_v20  ;;  %vm1074_vm3 = vmmov 0  }
  0xa3   :  { %830 = vmatprep.subr.msk.mxu0 %vm155_vm4, %v1072_v20  ;;  %v129_v30 = vpop.permute.xlu0 %128  ;;  %v126_v31 = vpop.permute.xlu1 %125  ;;  %863 = vmatprep.mubr.msk.bf16.mxu1 %vm1074_vm3, %v1073_v21 }
  0xa4   :  { %831 = vmatpush3.msk.msra.mxu0 %vm155_vm4, %v1072_v20  ;;  %vm153_vm6 = vcmp.eq.s32.totalorder %v1201_v25, %v129_v30  ;;  %vm152_vm7 = vcmp.eq.s32.totalorder %v1201_v25, %v126_v31 }
  0xa5   :  { %832 = vmatprep.subr.msk.mxu0 %vm154_vm5, %v1072_v20 }
  0xa6   :  { %833 = vmatpush3.msk.msra.mxu0 %vm154_vm5, %v1072_v20  ;;  %vm285_vm5 = vcmask 130048  }
  0xa7   :  { %834 = vmatprep.subr.msk.mxu0 %vm153_vm6, %v1072_v20  ;;  %v123_v32 = vpop.permute.xlu0 %122  ;;  %v120_v33 = vpop.permute.xlu1 %119 }
  0xa8   :  { %835 = vmatpush3.msk.msra.mxu0 %vm153_vm6, %v1072_v20  ;;  %vm151_vm8 = vcmp.eq.s32.totalorder %v1201_v25, %v123_v32  ;;  %vm150_vm9 = vcmp.eq.s32.totalorder %v1201_v25, %v120_v33 }
  0xa9   :  { %836 = vmatprep.subr.msk.mxu0 %vm152_vm7, %v1072_v20 }
  0xaa   :  { %837 = vmatpush3.msk.msra.mxu0 %vm152_vm7, %v1072_v20 }
  0xab   :  { %838 = vmatprep.subr.msk.mxu0 %vm151_vm8, %v1072_v20  ;;  %v117_v34 = vpop.permute.xlu0 %116  ;;  %v114_v35 = vpop.permute.xlu1 %113 }
  0xac   :  { %839 = vmatpush3.msk.msra.mxu0 %vm151_vm8, %v1072_v20  ;;  %vm149_vm10 = vcmp.eq.s32.totalorder %v1201_v25, %v117_v34  ;;  %vm148_vm11 = vcmp.eq.s32.totalorder %v1201_v25, %v114_v35 }
  0xad   :  { %840 = vmatprep.subr.msk.mxu0 %vm150_vm9, %v1072_v20 }
  0xae   :  { %841 = vmatpush3.msk.msra.mxu0 %vm150_vm9, %v1072_v20 }
  0xaf   :  { %842 = vmatprep.subr.msk.mxu0 %vm149_vm10, %v1072_v20  ;;  %v111_v36 = vpop.permute.xlu0 %110  ;;  %v108_v37 = vpop.permute.xlu1 %107 }
  0xb0   :  { %843 = vmatpush3.msk.msra.mxu0 %vm149_vm10, %v1072_v20  ;;  %vm147_vm12 = vcmp.eq.s32.totalorder %v1201_v25, %v111_v36  ;;  %vm146_vm13 = vcmp.eq.s32.totalorder %v1201_v25, %v108_v37 }
  0xb1   :  { %844 = vmatprep.subr.msk.mxu0 %vm148_vm11, %v1072_v20 }
  0xb2   :  { %845 = vmatpush3.msk.msra.mxu0 %vm148_vm11, %v1072_v20 }
  0xb3   :  { %846 = vmatprep.subr.msk.mxu0 %vm147_vm12, %v1072_v20  ;;  %v105_v38 = vpop.permute.xlu0 %104  ;;  %v102_v39 = vpop.permute.xlu1 %101 }
  0xb4   :  { %847 = vmatpush3.msk.msra.mxu0 %vm147_vm12, %v1072_v20  ;;  %vm145_vm14 = vcmp.eq.s32.totalorder %v1201_v25, %v105_v38  ;;  %vm144_vm15 = vcmp.eq.s32.totalorder %v1201_v25, %v102_v39 }
  0xb5   :  { %848 = vmatprep.subr.msk.mxu0 %vm146_vm13, %v1072_v20 }
  0xb6   :  { %849 = vmatpush3.msk.msra.mxu0 %vm146_vm13, %v1072_v20 }
  0xb7   :  { %850 = vmatprep.subr.msk.mxu0 %vm145_vm14, %v1072_v20  ;;  %v99_v40 = vpop.permute.xlu0 %98  ;;  %v96_v41 = vpop.permute.xlu1 %95 }
  0xb8   :  { %851 = vmatpush3.msk.msra.mxu0 %vm145_vm14, %v1072_v20  ;;  %vm143_vm0 = vcmp.eq.s32.totalorder %v1201_v25, %v99_v40  ;;  %vm142_vm2 = vcmp.eq.s32.totalorder %v1201_v25, %v96_v41  ;;  %v962_v25 = vld [vmem:[#allocation5 + $0x10] sm:$0xff]  }
  0xb9   :  { %852 = vmatprep.subr.msk.mxu0 %vm144_vm15, %v1072_v20 }
  0xba   :  { %853 = vmatpush3.msk.msra.mxu0 %vm144_vm15, %v1072_v20 }
  0xbb   :  { %854 = vmatprep.subr.msk.mxu0 %vm143_vm0, %v1072_v20 }
  0xbc   :  { %855 = vmatpush3.msk.msra.mxu0 %vm143_vm0, %v1072_v20 }
  0xbd   :  { %856 = vmatprep.subr.msk.mxu0 %vm142_vm2, %v1072_v20 }
  0xbe   :  { %857 = vmatpush3.msk.msra.mxu0 %vm142_vm2, %v1072_v20 }
  0xbf   :  { %859 = vmatmul.mubr.msk.f32.vlgmr.msra.gmra.mxu0 %vm71_vm1, %v1072_v20  ;;  %887 = vmatprep.subr.bf16.mxu0 %v1073_v21 }
  0xc0   :  { %903 = vmatprep.mubr.msk.bf16.mxu0 %vm1074_vm3, %v1073_v21  ;;  %888 = vmatpush3.bf16.msra.mxu0 %v943_v45 }
  0xc1   :  { %889 = vmatprep.subr.bf16.mxu0 %v1073_v21 }
  0xc4   :  { %890 = vmatpush3.bf16.msra.mxu0 %v945_v46 }
  0xc5   :  { %891 = vmatprep.subr.bf16.mxu0 %v1073_v21 }
  0xc8   :  { %892 = vmatpush3.bf16.msra.mxu0 %v947_v47 }
  0xc9   :  { %893 = vmatprep.subr.bf16.mxu0 %v1073_v21 }
  0xcc   :  { %894 = vmatpush3.bf16.msra.mxu0 %v949_v48 }
  0xcd   :  { %895 = vmatprep.subr.bf16.mxu0 %v1073_v21 }
  0xd0   :  { %896 = vmatpush3.bf16.msra.mxu0 %v951_v49 }
  0xd1   :  { %897 = vmatprep.subr.bf16.mxu0 %v1073_v21 }
  0xd4   :  { %898 = vmatpush3.bf16.msra.mxu0 %v953_v50 }
  0xd5   :  { %899 = vmatprep.subr.bf16.mxu0 %v1073_v21 }
  0xd8   :  { %900 = vmatpush3.bf16.msra.mxu0 %v955_v8 }
  0xd9   :  { %901 = vmatprep.subr.bf16.mxu0 %v1073_v21 }
  0xdc   :  { %902 = vmatpush3.bf16.msra.mxu0 %v956_v9 }
  0xe4   :  { %v266_v51 = vpop.xlane.xlu0 %265 }
  0xe5   :  { %v271_v53 = vmax.f32 %v266_v51, 1.0  ;;  %vm269_vm4 = vcmp.gt.f32.partialorder %v266_v51, 0.0 }
  0xe7   :  { %965 = vrcp.f32 %v271_v53 }
  0xe9   :  { %v268_v52 = vpop.xlane.xlu1 %267 }
  0xea   :  { %v272_v54 = vmax.f32 %v268_v52, 1.0  ;;  %vm270_vm1 = vcmp.gt.f32.partialorder %v268_v52, 0.0 }
  0xec   :  { %967 = vrcp.f32 %v272_v54 }
  0xf4   :  { %v966_v55 = vpop.eup %965 }
  0xf5   :  { %v277_v60 = vsel %vm269_vm4, %v966_v55, 0.0 }
  0xf9   :  { %v968_v56 = vpop.eup %967 }
  0xfa   :  { %v278_v58 = vsel %vm270_vm1, %v968_v56, 0.0 }
 0x17f   :  { %v860_v57 = vpop.f32.mrf.mxu0 }
 0x180   :  { %v280_v61 = vmul.f32 %v860_v57, %v278_v58 }
 0x181   :  { %v256_v59 = vpop.f32.mrf.mxu0 }
 0x182   :  { %v279_v62 = vmul.f32 %v277_v60, %v256_v59 }
 0x184   :  { %v281_v0 = vpack.c.bf16 %v280_v61, %v279_v62 }
 0x186   :  { %864 = vmatmul.mubr.msk.bf16.vlgmr.msra.gmra.mxu1 %vm285_vm5, %v281_v0 }
 0x187   :  { %868 = vmatpush3.bf16.msra.mxu1 %v941_v63  ;;  %883 = vmatprep.mubr.msk.bf16.mxu1 %vm1074_vm3, %v1073_v21 }
 0x188   :  { %869 = vmatprep.subr.bf16.mxu1 %v1073_v21 }
 0x18b   :  { %870 = vmatpush3.bf16.msra.mxu1 %v942_v1 }
 0x18c   :  { %871 = vmatprep.subr.bf16.mxu1 %v1073_v21 }
 0x18f   :  { %872 = vmatpush3.bf16.msra.mxu1 %v944_v2 }
 0x190   :  { %873 = vmatprep.subr.bf16.mxu1 %v1073_v21 }
 0x193   :  { %874 = vmatpush3.bf16.msra.mxu1 %v946_v3 }
 0x194   :  { %875 = vmatprep.subr.bf16.mxu1 %v1073_v21 }
 0x197   :  { %876 = vmatpush3.bf16.msra.mxu1 %v948_v4 }
 0x198   :  { %877 = vmatprep.subr.bf16.mxu1 %v1073_v21 }
 0x19b   :  { %878 = vmatpush3.bf16.msra.mxu1 %v950_v5 }
 0x19c   :  { %879 = vmatprep.subr.bf16.mxu1 %v1073_v21 }
 0x19f   :  { %880 = vmatpush3.bf16.msra.mxu1 %v952_v6 }
 0x1a0   :  { %881 = vmatprep.subr.bf16.mxu1 %v1073_v21 }
 0x1a3   :  { %882 = vmatpush3.bf16.msra.mxu1 %v954_v7 }
 0x1a4   :  { %907 = vmatprep.subr.bf16.mxu1 %v1073_v21 }
 0x1a6   :  { %884 = vmatmul.mubr.bf16.vlgmr.msra.gmra.mxu1 %v1256_v44 }
 0x1a7   :  { %923 = vmatprep.mubr.msk.bf16.mxu1 %vm1074_vm3, %v1073_v21  ;;  %908 = vmatpush3.bf16.msra.mxu1 %v957_v10 }
 0x1a8   :  { %909 = vmatprep.subr.bf16.mxu1 %v1073_v21 }
 0x1ab   :  { %910 = vmatpush3.bf16.msra.mxu1 %v958_v11 }
 0x1ac   :  { %911 = vmatprep.subr.bf16.mxu1 %v1073_v21 }
 0x1af   :  { %912 = vmatpush3.bf16.msra.mxu1 %v959_v12 }
 0x1b0   :  { %913 = vmatprep.subr.bf16.mxu1 %v1073_v21 }
 0x1b3   :  { %914 = vmatpush3.bf16.msra.mxu1 %v960_v13 }
 0x1b4   :  { %915 = vmatprep.subr.bf16.mxu1 %v1073_v21 }
 0x1b7   :  { %916 = vmatpush3.bf16.msra.mxu1 %v961_v14 }
 0x1b8   :  { %917 = vmatprep.subr.bf16.mxu1 %v1073_v21 }
 0x1bb   :  { %918 = vmatpush3.bf16.msra.mxu1 %v962_v25 }
 0x1bc   :  { %919 = vmatprep.subr.bf16.mxu1 %v1073_v21 }
 0x1bf   :  { %920 = vmatpush3.bf16.msra.mxu1 %v963_v26 }
 0x1c0   :  { %921 = vmatprep.subr.bf16.mxu1 %v1073_v21 }
 0x1c3   :  { %922 = vmatpush3.bf16.msra.mxu1 %v964_v27 }
 0x246   :  { %v323_v15 = vpop.f32.mrf.mxu1 }
 0x248   :  { %v865_v16 = vpop.f32.mrf.mxu1 }
 0x24a   :  { %v326_v17 = vpop.f32.mrf.mxu1 }
 0x24b   :  { %v330_v18 = vpack.c.bf16 %v326_v17, %v323_v15 }
 0x24c   :  { %v866_v19 = vpop.f32.mrf.mxu1 }
 0x24d   :  { %904 = vmatmul.mubr.bf16.vlgmr.msra.gmra.mxu0 %v330_v18 }
 0x266   :  { %v445_v20 = vpop.f32.mrf.mxu1 }
 0x268   :  { %v885_v22 = vpop.f32.mrf.mxu1 }
 0x26a   :  { %v448_v23 = vpop.f32.mrf.mxu1 }
 0x26c   :  { %v886_v24 = vpop.f32.mrf.mxu1 }
 0x30d   :  { %v534_v28 = vpop.f32.mrf.mxu0 }
 0x30e   :  { %v535_v30 = vadd.f32 %v534_v28, %v445_v20 }
 0x30f   :  { %v905_v31 = vpop.f32.mrf.mxu0 }
 0x310   :  { %v548_v32 = vadd.f32 %v767_v29, %v535_v30 }
 0x311   :  { %v537_v33 = vpop.f32.mrf.mxu0 }
 0x312   :  { %550 = vst [vmem:[#allocation7] sm:$0xff] %v548_v32  ;;  %v538_v34 = vadd.f32 %v537_v33, %v448_v23 }
 0x313   :  { %v906_v35 = vpop.f32.mrf.mxu0 }
 0x314   :  { %v549_v36 = vadd.f32 %v767_v29, %v538_v34 }
 0x316   :  { %v552_v37 = vpack.c.bf16 %v549_v36, %v548_v32  ;;  %551 = vst [vmem:[#allocation7 + $0x8] sm:$0xff] %v549_v36 }
 0x318   :  { %924 = vmatmul.mubr.bf16.vlgmr.msra.gmra.mxu1 %v552_v37 }
 0x319   :  { %1028 = shalt.err (!%p1025_p0)
}
 0x31a   :  { %690 = dma.vmem_to_hbm [thread:$0]  %s685_s2, 256, %s1365_s8, [#allocation4], %s1066_s12, %s1066_s12, %s1067_s13  }
 0x31b   :  { %v768_v21 = vld [vmem:[%s1364_s7] ss:$0 sm:$0xff]  ;;  %s1076_s8 = smov [#allocation8]  }
 0x31c   :  { %s696_s27 = sshll.u32 %s1076_s8, 4  ;;  %s697_s27 = int_to_ptr.vmem [resolvable:$true] %s696_s27 }
 0x31d   :  { %s1037_s7 = scalar_lea.vmem %s697_s27, 256  ;;  %p1042_p2 = scmp.lt.s32.totalorder %s697_s27, %s697_s27 }
 0x31e   :  { %p1038_p1 = scmp.ne.s32.totalorder %s697_s27, %s1037_s7  ;;  %p1043_p3 = scmp.lt.s32.totalorder %s1037_s7, %s1037_s7 }
 0x320   :  { %p1044_p4 = por %p1043_p3, %p1042_p2 }
 0x322   :  { %p1045_p5 = pnand %p1044_p4, %p1038_p1 }
 0x3d8   :  { %v658_v38 = vpop.f32.mrf.mxu1 }
 0x3d9   :  { %v659_v39 = vadd.f32 %v768_v21, %v658_v38 }
 0x3da   :  { %v925_v40 = vpop.f32.mrf.mxu1 }
 0x3db   :  { %v777_v41 = vmul.f32 -1.442695, %v659_v39 }
 0x3dc   :  { %v661_v42 = vpop.f32.mrf.mxu1 }
 0x3dd   :  { %969 = vpow2.f32 %v777_v41  ;;  %v662_v43 = vadd.f32 %v768_v21, %v661_v42 }
 0x3de   :  { %v926_v44 = vpop.f32.mrf.mxu1 }
 0x3df   :  { %v778_v45 = vmul.f32 -1.442695, %v662_v43 }
 0x3e1   :  { %971 = vpow2.f32 %v778_v45 }
 0x3ea   :  { %v970_v46 = vpop.eup %969 }
 0x3eb   :  { %v671_v47 = vadd.f32 1.0, %v970_v46 }
 0x3ed   :  { %973 = vrcp.f32 %v671_v47 }
 0x3ee   :  { %v972_v48 = vpop.eup %971 }
 0x3ef   :  { %v672_v49 = vadd.f32 1.0, %v972_v48 }
 0x3f1   :  { %975 = vrcp.f32 %v672_v49 }
 0x3fa   :  { %v974_v50 = vpop.eup %973 }
 0x3fb   :  { %677 = vst [vmem:[#allocation8] sm:$0xff] %v974_v50 }
 0x3fe   :  { %v976_v51 = vpop.eup %975 }
 0x3ff   :  { %678 = vst [vmem:[#allocation8 + $0x8] sm:$0xff] %v976_v51 }
 0x400   :  { %1048 = shalt.err (!%p1045_p5)
}
 0x401   :  { %702 = dma.vmem_to_hbm [thread:$0]  %s697_s27, 256, %s1366_s9, [#allocation9], %s1066_s12, %s1066_s12, %s1067_s13  }
 0x402   :  { %1061 = dma.done.wait [#allocation4], 256  }
 0x403   :  { %1062 = vsyncadd [#allocation4], 4294967040 }
 0x404   :  { %1063 = dma.done.wait [#allocation9], 256  }
 0x405   :  { %1064 = vsyncadd [#allocation9], 4294967040 }
 0x406   :  { %709 = vsyncpa [#allocation3], 1 }
 0x407   :  { %710 = vsyncpa [#allocation6], 1 }
 0x408   :  { %711 = vsyncpa [#allocation4], 1 }
 0x409   :  { %712 = vsyncpa [#allocation9], 1 }

</bundles_post_ra>
